<compile_context>
chip_gen: v5e
topology: v5e:2x2
jax: 0.10.0
libtpu: 0.0.40
codegen_flags: <defaults>
</compile_context>

<pallas_src>
import functools

import jax
import jax.numpy as jnp
from jax.experimental import pallas as pl
from jax.experimental.pallas import tpu as pltpu


def _round_up(x, m):
    return (x + m - 1) // m * m


# -----------------------------------------------------------------------------
# Generic tiled GEMM + bias [+ residual] Pallas kernels.
# -----------------------------------------------------------------------------
def _linear_kernel(x_ref, w_ref, b_ref, o_ref):
    # x_ref: (tm, Kp) bf16, w_ref: (Kp, tn) bf16, b_ref: (1, tn) f32,
    # o_ref: (tm, tn) f32
    acc = jnp.dot(x_ref[...], w_ref[...], preferred_element_type=jnp.float32)
    o_ref[...] = (acc + b_ref[...]).astype(o_ref.dtype)


def _linear_residual_kernel(x_ref, w_ref, b_ref, r_ref, o_ref):
    # Same as above plus a fused residual add: o = x @ w + b + r.
    acc = jnp.dot(x_ref[...], w_ref[...], preferred_element_type=jnp.float32)
    o_ref[...] = (acc + b_ref[...] + r_ref[...]).astype(o_ref.dtype)


def _pick_tn(n_padded):
    if n_padded <= 1024:
        return n_padded
    for cand in (1024, 512, 256, 128):
        if n_padded % cand == 0:
            return cand
    return 128


def pallas_linear(x, w, b, residual=None, *, tm=512, compute_dtype=jnp.bfloat16):
    """y = x @ w + b (+ residual). x:(M,K), w:(K,N), b:(N,), residual:(M,N).

    Returns (M, N) float32.
    """
    M, K = x.shape
    K2, N = w.shape
    assert K == K2 and b.shape == (N,)
    if residual is not None:
        assert residual.shape == (M, N)

    Kp = _round_up(K, 128)            # lane-dense contraction axis
    Np = _round_up(N, 128)            # lane-dense output -> unmasked stores
    tm = min(tm, _round_up(M, 16))    # 16-aligned sublanes for bf16 packing
    Mp = _round_up(M, tm)
    tn = _pick_tn(Np)

    xp = jnp.pad(x, ((0, Mp - M), (0, Kp - K))).astype(compute_dtype)
    wp = jnp.pad(w, ((0, Kp - K), (0, Np - N))).astype(compute_dtype)
    bp = jnp.pad(b.astype(jnp.float32), (0, Np - N)).reshape(1, Np)

    grid_n = Np // tn
    grid_m = Mp // tm

    bytes_accessed = (Mp * Kp + Kp * Np) * 2 + Np * 4 + Mp * Np * 4
    if residual is not None:
        bytes_accessed += Mp * Np * 4
    cost = pl.CostEstimate(flops=2 * Mp * Kp * Np, transcendentals=0,
                           bytes_accessed=bytes_accessed)

    # N axis outer, M axis inner: the weight/bias blocks keep the same block
    # index across the whole inner M sweep -> stay VMEM-resident.
    in_specs = [
        pl.BlockSpec((tm, Kp), lambda j, i: (i, 0)),
        pl.BlockSpec((Kp, tn), lambda j, i: (0, j)),
        pl.BlockSpec((1, tn), lambda j, i: (0, j)),
    ]
    operands = [xp, wp, bp]
    kernel = _linear_kernel
    if residual is not None:
        rp = jnp.pad(residual.astype(jnp.float32), ((0, Mp - M), (0, Np - N)))
        in_specs.append(pl.BlockSpec((tm, tn), lambda j, i: (i, j)))
        operands.append(rp)
        kernel = _linear_residual_kernel

    out = pl.pallas_call(
        kernel,
        out_shape=jax.ShapeDtypeStruct((Mp, Np), jnp.float32),
        grid_spec=pltpu.PrefetchScalarGridSpec(
            num_scalar_prefetch=0,
            grid=(grid_n, grid_m),
            in_specs=in_specs,
            out_specs=pl.BlockSpec((tm, tn), lambda j, i: (i, j)),
        ),
        compiler_params=pltpu.CompilerParams(
            # Independent axes -> shardable across v7x's two TensorCores.
            dimension_semantics=("parallel", "parallel"),
            # Above the 16/32 MiB scoped default, below v7x's 64 MiB physical.
            vmem_limit_bytes=48 * 1024 * 1024,
        ),
        cost_estimate=cost,
    )(*operands)

    return out[:M, :N]


def reference_linear(x, w, b, residual=None, *, compute_dtype=jnp.bfloat16):
    """Pure-JAX reference for the kernel (same bf16-in / f32-accumulate math)."""
    xc = x.astype(compute_dtype).astype(jnp.float32)
    wc = w.astype(compute_dtype).astype(jnp.float32)
    y = xc @ wc + b.astype(jnp.float32)
    if residual is not None:
        y = y + residual.astype(jnp.float32)
    return y


# -----------------------------------------------------------------------------
# ViT forward (eval mode: all dropout / drop-path are identity).
# -----------------------------------------------------------------------------
def _layer_norm(x, gamma, beta, eps=1e-6):
    mu = jnp.mean(x, axis=-1, keepdims=True)
    var = jnp.mean(jnp.square(x - mu), axis=-1, keepdims=True)
    return (x - mu) * jax.lax.rsqrt(var + eps) * gamma + beta


def vit_forward(params, x, *, cfg, linear):
    P = cfg["patch_size"]
    E = cfg["embed_dim"]
    n_heads = cfg["num_heads"]
    B, C, H, W = x.shape
    gh, gw = H // P, W // P
    n_patches = gh * gw
    head_dim = E // n_heads
    scale = head_dim ** -0.5

    # --- PatchEmbed: stride==kernel Conv2d == GEMM over flattened patches -----
    xp = x.reshape(B, C, gh, P, gw, P)
    xp = jnp.transpose(xp, (0, 2, 4, 1, 3, 5)).reshape(B * n_patches, C * P * P)
    # TODO(synk): the NCHW->patch transpose is left to XLA; folding this gather
    # into the kernel index_map would save one HBM round-trip of the activation.
    patch_w = params["patch_w"].reshape(E, C * P * P).T      # (K, E), conv-flatten order
    tokens = linear(xp, patch_w, params["patch_b"]).reshape(B, n_patches, E)

    # --- cls token + positional embedding (pos_drop is identity in eval) ------
    cls = jnp.broadcast_to(params["cls_token"], (B, 1, E))
    tokens = jnp.concatenate([cls, tokens], axis=1) + params["pos_embed"]
    n_tok = n_patches + 1

    # --- encoder blocks --------------------------------------------------------
    for blk in params["blocks"]:
        # attention branch
        h = _layer_norm(tokens, blk["ln1_g"], blk["ln1_b"])
        qkv = linear(h.reshape(B * n_tok, E), blk["qkv_w"], blk["qkv_b"])
        qkv = qkv.reshape(B, n_tok, 3, n_heads, head_dim)
        qkv = jnp.transpose(qkv, (2, 0, 3, 1, 4))
        q, k, v = qkv[0], qkv[1], qkv[2]
        attn = jnp.einsum("bhqd,bhkd->bhqk", q, k) * scale
        attn = jax.nn.softmax(attn, axis=-1)
        ctx = jnp.einsum("bhqk,bhkd->bhqd", attn, v)
        ctx = jnp.transpose(ctx, (0, 2, 1, 3)).reshape(B * n_tok, E)
        # residual add fused into the output-projection GEMM epilogue
        tokens = linear(ctx, blk["proj_w"], blk["proj_b"],
                        residual=tokens.reshape(B * n_tok, E)).reshape(B, n_tok, E)
        # MLP branch
        h = _layer_norm(tokens, blk["ln2_g"], blk["ln2_b"]).reshape(B * n_tok, E)
        h = linear(h, blk["fc1_w"], blk["fc1_b"])
        # TODO(synk): exact-erf GELU could be fused into the fc1 kernel epilogue
        # if/when erf lowering is guaranteed in Mosaic; kept in JAX for safety.
        h = jax.nn.gelu(h, approximate=False)        # nn.GELU() exact (erf) variant
        # residual add fused into the fc2 GEMM epilogue
        tokens = linear(h, blk["fc2_w"], blk["fc2_b"],
                        residual=tokens.reshape(B * n_tok, E)).reshape(B, n_tok, E)

    tokens = _layer_norm(tokens, params["ln_g"], params["ln_b"])
    cls_out = tokens[:, 0]                           # pre_logits = Identity
    logits = linear(cls_out, params["head_w"], params["head_b"])
    return logits


# -----------------------------------------------------------------------------
# Parameter init (small random values; shapes match the PyTorch module).
# -----------------------------------------------------------------------------
def init_vit_params(key, *, img_size, patch_size, in_chans, embed_dim, depth,
                    num_heads, num_classes):
    del num_heads  # only used in forward cfg
    n_patches = (img_size // patch_size) ** 2
    keys = jax.random.split(key, 6 + depth)

    def dense(k, fan_in, fan_out):
        kw, kb = jax.random.split(k)
        w = jax.random.normal(kw, (fan_in, fan_out), jnp.float32) * 0.02
        b = jax.random.normal(kb, (fan_out,), jnp.float32) * 0.02
        return w, b

    params = {}
    params["patch_w"] = jax.random.normal(
        keys[0], (embed_dim, in_chans, patch_size, patch_size), jnp.float32) * 0.02
    params["patch_b"] = jax.random.normal(keys[1], (embed_dim,), jnp.float32) * 0.02
    params["cls_token"] = jax.random.normal(keys[2], (1, 1, embed_dim), jnp.float32) * 0.02
    params["pos_embed"] = jax.random.normal(
        keys[3], (1, n_patches + 1, embed_dim), jnp.float32) * 0.02

    blocks = []
    for d in range(depth):
        bk = jax.random.split(keys[6 + d], 4)
        qkv_w, qkv_b = dense(bk[0], embed_dim, 3 * embed_dim)
        proj_w, proj_b = dense(bk[1], embed_dim, embed_dim)
        fc1_w, fc1_b = dense(bk[2], embed_dim, 4 * embed_dim)
        fc2_w, fc2_b = dense(bk[3], 4 * embed_dim, embed_dim)
        blocks.append(dict(
            ln1_g=jnp.ones((embed_dim,), jnp.float32),
            ln1_b=jnp.zeros((embed_dim,), jnp.float32),
            ln2_g=jnp.ones((embed_dim,), jnp.float32),
            ln2_b=jnp.zeros((embed_dim,), jnp.float32),
            qkv_w=qkv_w, qkv_b=qkv_b, proj_w=proj_w, proj_b=proj_b,
            fc1_w=fc1_w, fc1_b=fc1_b, fc2_w=fc2_w, fc2_b=fc2_b))
    params["blocks"] = blocks

    params["ln_g"] = jnp.ones((embed_dim,), jnp.float32)
    params["ln_b"] = jnp.zeros((embed_dim,), jnp.float32)
    head_w, head_b = dense(keys[4], embed_dim, num_classes)
    params["head_w"] = head_w
    params["head_b"] = head_b
    return params


if __name__ == "__main__":
    # Small shapes consistent with the module: 16x16 image, patch 4, dim 32.
    B, C = 2, 3
    img_size, patch_size = 16, 4
    embed_dim, depth, num_heads, num_classes = 32, 2, 4, 10

    root = jax.random.PRNGKey(0)
    k_params, k_x = jax.random.split(root)
    params = init_vit_params(
        k_params, img_size=img_size, patch_size=patch_size, in_chans=C,
        embed_dim=embed_dim, depth=depth, num_heads=num_heads,
        num_classes=num_classes)
    x = jax.random.normal(k_x, (B, C, img_size, img_size), jnp.float32)

    cfg = dict(patch_size=patch_size, embed_dim=embed_dim, num_heads=num_heads)

    fwd_pallas = jax.jit(functools.partial(vit_forward, cfg=cfg, linear=pallas_linear))
    fwd_ref = jax.jit(functools.partial(vit_forward, cfg=cfg, linear=reference_linear))

    logits = jax.block_until_ready(fwd_pallas(params, x))
    ref = jax.block_until_ready(fwd_ref(params, x))

    assert logits.shape == (B, num_classes)
    assert jnp.allclose(logits, ref, atol=1e-3, rtol=1e-3), (
        float(jnp.max(jnp.abs(logits - ref))))

    # Isolated check of the plain GEMM path (patch-embed projection).
    gh = gw = img_size // patch_size
    xp = jnp.transpose(
        x.reshape(B, C, gh, patch_size, gw, patch_size),
        (0, 2, 4, 1, 3, 5)).reshape(B * gh * gw, C * patch_size * patch_size)
    w_flat = params["patch_w"].reshape(embed_dim, -1).T
    pe = jax.block_until_ready(pallas_linear(xp, w_flat, params["patch_b"]))
    pe_ref = reference_linear(xp, w_flat, params["patch_b"])
    assert pe.shape == (B * gh * gw, embed_dim)
    assert jnp.allclose(pe, pe_ref, atol=1e-4, rtol=1e-4)

    # Isolated check of the fused-residual GEMM path.
    res = jax.random.normal(jax.random.PRNGKey(1), (B * gh * gw, embed_dim), jnp.float32)
    pr = jax.block_until_ready(
        pallas_linear(xp, w_flat, params["patch_b"], residual=res))
    pr_ref = reference_linear(xp, w_flat, params["patch_b"], residual=res)
    assert jnp.allclose(pr, pr_ref, atol=1e-4, rtol=1e-4)

    print("KERNEL_OK")
</pallas_src>

<mosaic_0001>
module attributes {stable_mosaic.version = 11 : i64} {
  func.func @_linear_kernel(%arg0: i32, %arg1: i32, %arg2: memref<32x128xbf16, #tpu.memory_space<vmem>>, %arg3: memref<128x128xbf16, #tpu.memory_space<vmem>>, %arg4: memref<1x128xf32, #tpu.memory_space<vmem>>, %arg5: memref<32x128xf32, #tpu.memory_space<vmem>>) attributes {dimension_semantics = [#tpu.dimension_semantics<parallel>, #tpu.dimension_semantics<parallel>], iteration_bounds = array<i64: 1, 1>, scalar_prefetch = 0 : i64, scratch_operands = 0 : i64, tpu.core_type = #tpu.core_type<tc>, window_params = [{transform_indices = @transform_0, window_bounds = array<i64: 32, 128>}, {transform_indices = @transform_1, window_bounds = array<i64: 128, 128>}, {transform_indices = @transform_2, window_bounds = array<i64: 1, 128>}, {transform_indices = @transform_3, window_bounds = array<i64: 32, 128>}]} {
    %c0 = arith.constant 0 : index
    %c0_0 = arith.constant 0 : index
    %0 = vector.load %arg2[%c0, %c0_0] : memref<32x128xbf16, #tpu.memory_space<vmem>>, vector<32x128xbf16>
    %c0_1 = arith.constant 0 : index
    %c0_2 = arith.constant 0 : index
    %1 = vector.load %arg3[%c0_1, %c0_2] : memref<128x128xbf16, #tpu.memory_space<vmem>>, vector<128x128xbf16>
    %cst = arith.constant dense<0.000000e+00> : vector<32x128xf32>
    %2 = tpu.matmul %0, %1, %cst {dimension_numbers = #tpu.dot_dimension_numbers<[1], [0], [0], [1], [0, 0, 1, 1], [], []>} : vector<32x128xbf16>, vector<128x128xbf16>, vector<32x128xf32> -> vector<32x128xf32>
    %c0_3 = arith.constant 0 : index
    %c0_4 = arith.constant 0 : index
    %3 = vector.load %arg4[%c0_3, %c0_4] : memref<1x128xf32, #tpu.memory_space<vmem>>, vector<1x128xf32>
    %4 = vector.broadcast %3 : vector<1x128xf32> to vector<32x128xf32>
    %5 = arith.addf %2, %4 : vector<32x128xf32>
    %c0_5 = arith.constant 0 : index
    %c0_6 = arith.constant 0 : index
    %6 = vector.load %arg5[%c0_5, %c0_6] : memref<32x128xf32, #tpu.memory_space<vmem>>, vector<32x128xf32>
    tpu.vector_store %arg5[%c0_5, %c0_6], %5 {strides = array<i32>} : memref<32x128xf32, #tpu.memory_space<vmem>>, vector<32x128xf32>,
    return
  }
  func.func @transform_0(%arg0: i32, %arg1: i32) -> (i32, i32) {
    %c0_i32 = arith.constant 0 : i32
    %c0_i32_0 = arith.constant 0 : i32
    return %arg1, %c0_i32 : i32, i32
  }
  func.func @transform_1(%arg0: i32, %arg1: i32) -> (i32, i32) {
    %c0_i32 = arith.constant 0 : i32
    %c0_i32_0 = arith.constant 0 : i32
    return %c0_i32, %arg0 : i32, i32
  }
  func.func @transform_2(%arg0: i32, %arg1: i32) -> (i32, i32) {
    %c0_i32 = arith.constant 0 : i32
    %c0_i32_0 = arith.constant 0 : i32
    return %c0_i32, %arg0 : i32, i32
  }
  func.func @transform_3(%arg0: i32, %arg1: i32) -> (i32, i32) {
    %c0_i32 = arith.constant 0 : i32
    return %arg1, %arg0 : i32, i32
  }
}

module attributes {stable_mosaic.version = 11 : i64} {
  func.func @_linear_kernel(%arg0: i32, %arg1: i32, %arg2: memref<48x128xbf16, #tpu.memory_space<vmem>>, %arg3: memref<128x128xbf16, #tpu.memory_space<vmem>>, %arg4: memref<1x128xf32, #tpu.memory_space<vmem>>, %arg5: memref<48x128xf32, #tpu.memory_space<vmem>>) attributes {dimension_semantics = [#tpu.dimension_semantics<parallel>, #tpu.dimension_semantics<parallel>], iteration_bounds = array<i64: 1, 1>, scalar_prefetch = 0 : i64, scratch_operands = 0 : i64, tpu.core_type = #tpu.core_type<tc>, window_params = [{transform_indices = @transform_0, window_bounds = array<i64: 48, 128>}, {transform_indices = @transform_1, window_bounds = array<i64: 128, 128>}, {transform_indices = @transform_2, window_bounds = array<i64: 1, 128>}, {transform_indices = @transform_3, window_bounds = array<i64: 48, 128>}]} {
    %c0 = arith.constant 0 : index
    %c0_0 = arith.constant 0 : index
    %0 = vector.load %arg2[%c0, %c0_0] : memref<48x128xbf16, #tpu.memory_space<vmem>>, vector<48x128xbf16>
    %c0_1 = arith.constant 0 : index
    %c0_2 = arith.constant 0 : index
    %1 = vector.load %arg3[%c0_1, %c0_2] : memref<128x128xbf16, #tpu.memory_space<vmem>>, vector<128x128xbf16>
    %cst = arith.constant dense<0.000000e+00> : vector<48x128xf32>
    %2 = tpu.matmul %0, %1, %cst {dimension_numbers = #tpu.dot_dimension_numbers<[1], [0], [0], [1], [0, 0, 1, 1], [], []>} : vector<48x128xbf16>, vector<128x128xbf16>, vector<48x128xf32> -> vector<48x128xf32>
    %c0_3 = arith.constant 0 : index
    %c0_4 = arith.constant 0 : index
    %3 = vector.load %arg4[%c0_3, %c0_4] : memref<1x128xf32, #tpu.memory_space<vmem>>, vector<1x128xf32>
    %4 = vector.broadcast %3 : vector<1x128xf32> to vector<48x128xf32>
    %5 = arith.addf %2, %4 : vector<48x128xf32>
    %c0_5 = arith.constant 0 : index
    %c0_6 = arith.constant 0 : index
    %6 = vector.load %arg5[%c0_5, %c0_6] : memref<48x128xf32, #tpu.memory_space<vmem>>, vector<48x128xf32>
    tpu.vector_store %arg5[%c0_5, %c0_6], %5 {strides = array<i32>} : memref<48x128xf32, #tpu.memory_space<vmem>>, vector<48x128xf32>,
    return
  }
  func.func @transform_0(%arg0: i32, %arg1: i32) -> (i32, i32) {
    %c0_i32 = arith.constant 0 : i32
    %c0_i32_0 = arith.constant 0 : i32
    return %arg1, %c0_i32 : i32, i32
  }
  func.func @transform_1(%arg0: i32, %arg1: i32) -> (i32, i32) {
    %c0_i32 = arith.constant 0 : i32
    %c0_i32_0 = arith.constant 0 : i32
    return %c0_i32, %arg0 : i32, i32
  }
  func.func @transform_2(%arg0: i32, %arg1: i32) -> (i32, i32) {
    %c0_i32 = arith.constant 0 : i32
    %c0_i32_0 = arith.constant 0 : i32
    return %c0_i32, %arg0 : i32, i32
  }
  func.func @transform_3(%arg0: i32, %arg1: i32) -> (i32, i32) {
    %c0_i32 = arith.constant 0 : i32
    return %arg1, %arg0 : i32, i32
  }
}

module attributes {stable_mosaic.version = 11 : i64} {
  func.func @_linear_residual_kernel(%arg0: i32, %arg1: i32, %arg2: memref<48x128xbf16, #tpu.memory_space<vmem>>, %arg3: memref<128x128xbf16, #tpu.memory_space<vmem>>, %arg4: memref<1x128xf32, #tpu.memory_space<vmem>>, %arg5: memref<48x128xf32, #tpu.memory_space<vmem>>, %arg6: memref<48x128xf32, #tpu.memory_space<vmem>>) attributes {dimension_semantics = [#tpu.dimension_semantics<parallel>, #tpu.dimension_semantics<parallel>], iteration_bounds = array<i64: 1, 1>, scalar_prefetch = 0 : i64, scratch_operands = 0 : i64, tpu.core_type = #tpu.core_type<tc>, window_params = [{transform_indices = @transform_0, window_bounds = array<i64: 48, 128>}, {transform_indices = @transform_1, window_bounds = array<i64: 128, 128>}, {transform_indices = @transform_2, window_bounds = array<i64: 1, 128>}, {transform_indices = @transform_3, window_bounds = array<i64: 48, 128>}, {transform_indices = @transform_4, window_bounds = array<i64: 48, 128>}]} {
    %c0 = arith.constant 0 : index
    %c0_0 = arith.constant 0 : index
    %0 = vector.load %arg2[%c0, %c0_0] : memref<48x128xbf16, #tpu.memory_space<vmem>>, vector<48x128xbf16>
    %c0_1 = arith.constant 0 : index
    %c0_2 = arith.constant 0 : index
    %1 = vector.load %arg3[%c0_1, %c0_2] : memref<128x128xbf16, #tpu.memory_space<vmem>>, vector<128x128xbf16>
    %cst = arith.constant dense<0.000000e+00> : vector<48x128xf32>
    %2 = tpu.matmul %0, %1, %cst {dimension_numbers = #tpu.dot_dimension_numbers<[1], [0], [0], [1], [0, 0, 1, 1], [], []>} : vector<48x128xbf16>, vector<128x128xbf16>, vector<48x128xf32> -> vector<48x128xf32>
    %c0_3 = arith.constant 0 : index
    %c0_4 = arith.constant 0 : index
    %3 = vector.load %arg4[%c0_3, %c0_4] : memref<1x128xf32, #tpu.memory_space<vmem>>, vector<1x128xf32>
    %4 = vector.broadcast %3 : vector<1x128xf32> to vector<48x128xf32>
    %5 = arith.addf %2, %4 : vector<48x128xf32>
    %c0_5 = arith.constant 0 : index
    %c0_6 = arith.constant 0 : index
    %6 = vector.load %arg5[%c0_5, %c0_6] : memref<48x128xf32, #tpu.memory_space<vmem>>, vector<48x128xf32>
    %7 = arith.addf %5, %6 : vector<48x128xf32>
    %c0_7 = arith.constant 0 : index
    %c0_8 = arith.constant 0 : index
    %8 = vector.load %arg6[%c0_7, %c0_8] : memref<48x128xf32, #tpu.memory_space<vmem>>, vector<48x128xf32>
    tpu.vector_store %arg6[%c0_7, %c0_8], %7 {strides = array<i32>} : memref<48x128xf32, #tpu.memory_space<vmem>>, vector<48x128xf32>,
    return
  }
  func.func @transform_0(%arg0: i32, %arg1: i32) -> (i32, i32) {
    %c0_i32 = arith.constant 0 : i32
    %c0_i32_0 = arith.constant 0 : i32
    return %arg1, %c0_i32 : i32, i32
  }
  func.func @transform_1(%arg0: i32, %arg1: i32) -> (i32, i32) {
    %c0_i32 = arith.constant 0 : i32
    %c0_i32_0 = arith.constant 0 : i32
    return %c0_i32, %arg0 : i32, i32
  }
  func.func @transform_2(%arg0: i32, %arg1: i32) -> (i32, i32) {
    %c0_i32 = arith.constant 0 : i32
    %c0_i32_0 = arith.constant 0 : i32
    return %c0_i32, %arg0 : i32, i32
  }
  func.func @transform_3(%arg0: i32, %arg1: i32) -> (i32, i32) {
    %c0_i32 = arith.constant 0 : i32
    return %arg1, %arg0 : i32, i32
  }
  func.func @transform_4(%arg0: i32, %arg1: i32) -> (i32, i32) {
    %c0_i32 = arith.constant 0 : i32
    return %arg1, %arg0 : i32, i32
  }
}

module attributes {stable_mosaic.version = 11 : i64} {
  func.func @_linear_kernel(%arg0: i32, %arg1: i32, %arg2: memref<16x128xbf16, #tpu.memory_space<vmem>>, %arg3: memref<128x128xbf16, #tpu.memory_space<vmem>>, %arg4: memref<1x128xf32, #tpu.memory_space<vmem>>, %arg5: memref<16x128xf32, #tpu.memory_space<vmem>>) attributes {dimension_semantics = [#tpu.dimension_semantics<parallel>, #tpu.dimension_semantics<parallel>], iteration_bounds = array<i64: 1, 1>, scalar_prefetch = 0 : i64, scratch_operands = 0 : i64, tpu.core_type = #tpu.core_type<tc>, window_params = [{transform_indices = @transform_0, window_bounds = array<i64: 16, 128>}, {transform_indices = @transform_1, window_bounds = array<i64: 128, 128>}, {transform_indices = @transform_2, window_bounds = array<i64: 1, 128>}, {transform_indices = @transform_3, window_bounds = array<i64: 16, 128>}]} {
    %c0 = arith.constant 0 : index
    %c0_0 = arith.constant 0 : index
    %0 = vector.load %arg2[%c0, %c0_0] : memref<16x128xbf16, #tpu.memory_space<vmem>>, vector<16x128xbf16>
    %c0_1 = arith.constant 0 : index
    %c0_2 = arith.constant 0 : index
    %1 = vector.load %arg3[%c0_1, %c0_2] : memref<128x128xbf16, #tpu.memory_space<vmem>>, vector<128x128xbf16>
    %cst = arith.constant dense<0.000000e+00> : vector<16x128xf32>
    %2 = tpu.matmul %0, %1, %cst {dimension_numbers = #tpu.dot_dimension_numbers<[1], [0], [0], [1], [0, 0, 1, 1], [], []>} : vector<16x128xbf16>, vector<128x128xbf16>, vector<16x128xf32> -> vector<16x128xf32>
    %c0_3 = arith.constant 0 : index
    %c0_4 = arith.constant 0 : index
    %3 = vector.load %arg4[%c0_3, %c0_4] : memref<1x128xf32, #tpu.memory_space<vmem>>, vector<1x128xf32>
    %4 = vector.broadcast %3 : vector<1x128xf32> to vector<16x128xf32>
    %5 = arith.addf %2, %4 : vector<16x128xf32>
    %c0_5 = arith.constant 0 : index
    %c0_6 = arith.constant 0 : index
    %6 = vector.load %arg5[%c0_5, %c0_6] : memref<16x128xf32, #tpu.memory_space<vmem>>, vector<16x128xf32>
    tpu.vector_store %arg5[%c0_5, %c0_6], %5 {strides = array<i32>} : memref<16x128xf32, #tpu.memory_space<vmem>>, vector<16x128xf32>,
    return
  }
  func.func @transform_0(%arg0: i32, %arg1: i32) -> (i32, i32) {
    %c0_i32 = arith.constant 0 : i32
    %c0_i32_0 = arith.constant 0 : i32
    return %arg1, %c0_i32 : i32, i32
  }
  func.func @transform_1(%arg0: i32, %arg1: i32) -> (i32, i32) {
    %c0_i32 = arith.constant 0 : i32
    %c0_i32_0 = arith.constant 0 : i32
    return %c0_i32, %arg0 : i32, i32
  }
  func.func @transform_2(%arg0: i32, %arg1: i32) -> (i32, i32) {
    %c0_i32 = arith.constant 0 : i32
    %c0_i32_0 = arith.constant 0 : i32
    return %c0_i32, %arg0 : i32, i32
  }
  func.func @transform_3(%arg0: i32, %arg1: i32) -> (i32, i32) {
    %c0_i32 = arith.constant 0 : i32
    return %arg1, %arg0 : i32, i32
  }
}

</mosaic_0001>

<bundles_post_ra>
// kernel: vit_forward.10
= control target key start
LH: loop header
LB: loop body
LE: loop exit
PB: predicated region body
PF: predicated region fallthrough
CT: control target
= control target key end

     0   :  { %s249_s1 = inlined_call_operand.vmem [shape: bf16[128,128], index: 1, kind: input, shape index: {}]   ;;  %s250_s2 = inlined_call_operand.vmem [shape: f32[1,128], index: 2, kind: input, shape index: {}]   ;;  %s251_s0 = inlined_call_operand.vmem [shape: bf16[32,128], index: 0, kind: input, shape index: {}]   ;;  %s252_s3 = inlined_call_operand.vmem [shape: f32[32,128], index: 3, kind: output, shape index: {}]  }
   0x1   :  { %v174_v0 = vld [vmem:[%s249_s1 + $0x38] sm:$0xff]  ;;  %v173_v1 = vld [vmem:[%s249_s1 + $0x30] sm:$0xff]  ;;  %v172_v2 = vld [vmem:[%s249_s1 + $0x28] sm:$0xff] }
   0x2   :  { %98 = vmatpush.bf16.msra.mxu0 %v174_v0  ;;  %175 = vmatpush.bf16.msra.mxu1 %v174_v0  ;;  %v171_v3 = vld [vmem:[%s249_s1 + $0x20] sm:$0xff]  ;;  %v170_v4 = vld [vmem:[%s249_s1 + $0x18] sm:$0xff]  ;;  %v169_v5 = vld [vmem:[%s249_s1 + $0x10] sm:$0xff] }
   0x3   :  { %v168_v6 = vld [vmem:[%s249_s1 + $0x8] sm:$0xff]  ;;  %v167_v7 = vld [vmem:[%s249_s1] sm:$0xff] }
   0x4   :  { %v165_v8 = vld [vmem:[%s251_s0] sm:$0xff]  ;;  %v166_v9 = vld [vmem:[%s251_s0 + $0x8] sm:$0xff] }
   0x5   :  { %v183_v10 = vld [vmem:[%s250_s2] ss:$0 sm:$0xff] }
   0x6   :  { %99 = vmatpush.bf16.msra.mxu0 %v173_v1  ;;  %176 = vmatpush.bf16.msra.mxu1 %v173_v1 }
   0xa   :  { %100 = vmatpush.bf16.msra.mxu0 %v172_v2  ;;  %177 = vmatpush.bf16.msra.mxu1 %v172_v2 }
   0xe   :  { %101 = vmatpush.bf16.msra.mxu0 %v171_v3  ;;  %178 = vmatpush.bf16.msra.mxu1 %v171_v3 }
  0x12   :  { %102 = vmatpush.bf16.msra.mxu0 %v170_v4  ;;  %179 = vmatpush.bf16.msra.mxu1 %v170_v4 }
  0x16   :  { %103 = vmatpush.bf16.msra.mxu0 %v169_v5  ;;  %180 = vmatpush.bf16.msra.mxu1 %v169_v5 }
  0x1a   :  { %104 = vmatpush.bf16.msra.mxu0 %v168_v6  ;;  %181 = vmatpush.bf16.msra.mxu1 %v168_v6 }
  0x1e   :  { %105 = vmatpush.bf16.msra.mxu0 %v167_v7  ;;  %182 = vmatpush.bf16.msra.mxu1 %v167_v7 }
  0x21   :  { %106 = vmatmul.bf16.vlgmr.msra.gmra.mxu0 %v165_v8  ;;  %111 = vmatmul.bf16.vlgmr.msra.gmra.mxu1 %v166_v9 }
  0x9e   :  { %v107_v11 = vpop.f32.mrf.mxu0  ;;  %v112_v12 = vpop.f32.mrf.mxu1 }
  0x9f   :  { %v108_v13 = vadd.f32 %v183_v10, %v107_v11  ;;  %v113_v14 = vadd.f32 %v183_v10, %v112_v12 }
  0xa1   :  { %117 = vst [vmem:[%s252_s3] sm:$0xff] %v108_v13 }
  0xa2   :  { %119 = vst [vmem:[%s252_s3 + $0x10] sm:$0xff] %v113_v14 }
  0xa6   :  { %v109_v15 = vpop.f32.mrf.mxu0  ;;  %v114_v16 = vpop.f32.mrf.mxu1 }
  0xa7   :  { %v110_v17 = vadd.f32 %v183_v10, %v109_v15  ;;  %v115_v18 = vadd.f32 %v183_v10, %v114_v16 }
  0xa9   :  { %118 = vst [vmem:[%s252_s3 + $0x8] sm:$0xff] %v110_v17 }
  0xaa   :  { %120 = vst [vmem:[%s252_s3 + $0x18] sm:$0xff] %v115_v18 }

// kernel: vit_forward.11
= control target key start
LH: loop header
LB: loop body
LE: loop exit
PB: predicated region body
PF: predicated region fallthrough
CT: control target
= control target key end

     0   :  { %s286_s1 = inlined_call_operand.vmem [shape: bf16[128,128], index: 1, kind: input, shape index: {}]   ;;  %s287_s2 = inlined_call_operand.vmem [shape: f32[1,128], index: 2, kind: input, shape index: {}]   ;;  %s288_s0 = inlined_call_operand.vmem [shape: bf16[48,128], index: 0, kind: input, shape index: {}]   ;;  %s289_s3 = inlined_call_operand.vmem [shape: f32[48,128], index: 3, kind: output, shape index: {}]  }
   0x1   :  { %v194_v0 = vld [vmem:[%s286_s1 + $0x38] sm:$0xff]  ;;  %v193_v1 = vld [vmem:[%s286_s1 + $0x30] sm:$0xff]  ;;  %v192_v2 = vld [vmem:[%s286_s1 + $0x28] sm:$0xff] }
   0x2   :  { %106 = vmatpush.bf16.msra.mxu0 %v194_v0  ;;  %195 = vmatpush.bf16.msra.mxu1 %v194_v0  ;;  %v191_v3 = vld [vmem:[%s286_s1 + $0x20] sm:$0xff]  ;;  %v190_v4 = vld [vmem:[%s286_s1 + $0x18] sm:$0xff]  ;;  %v189_v5 = vld [vmem:[%s286_s1 + $0x10] sm:$0xff] }
   0x3   :  { %196 = vmatpush.bf16.msra.mxu2 %v194_v0  ;;  %v188_v6 = vld [vmem:[%s286_s1 + $0x8] sm:$0xff]  ;;  %v187_v7 = vld [vmem:[%s286_s1] sm:$0xff]  ;;  %v186_v10 = vld [vmem:[%s288_s0 + $0x10] sm:$0xff] }
   0x4   :  { %v184_v8 = vld [vmem:[%s288_s0] sm:$0xff]  ;;  %v185_v9 = vld [vmem:[%s288_s0 + $0x8] sm:$0xff] }
   0x5   :  { %v211_v11 = vld [vmem:[%s287_s2] ss:$0 sm:$0xff] }
   0x6   :  { %107 = vmatpush.bf16.msra.mxu0 %v193_v1  ;;  %197 = vmatpush.bf16.msra.mxu1 %v193_v1 }
   0x7   :  { %198 = vmatpush.bf16.msra.mxu2 %v193_v1 }
   0xa   :  { %108 = vmatpush.bf16.msra.mxu0 %v192_v2  ;;  %199 = vmatpush.bf16.msra.mxu1 %v192_v2 }
   0xb   :  { %200 = vmatpush.bf16.msra.mxu2 %v192_v2 }
   0xe   :  { %109 = vmatpush.bf16.msra.mxu0 %v191_v3  ;;  %201 = vmatpush.bf16.msra.mxu1 %v191_v3 }
   0xf   :  { %202 = vmatpush.bf16.msra.mxu2 %v191_v3 }
  0x12   :  { %110 = vmatpush.bf16.msra.mxu0 %v190_v4  ;;  %203 = vmatpush.bf16.msra.mxu1 %v190_v4 }
  0x13   :  { %204 = vmatpush.bf16.msra.mxu2 %v190_v4 }
  0x16   :  { %111 = vmatpush.bf16.msra.mxu0 %v189_v5  ;;  %205 = vmatpush.bf16.msra.mxu1 %v189_v5 }
  0x17   :  { %206 = vmatpush.bf16.msra.mxu2 %v189_v5 }
  0x1a   :  { %112 = vmatpush.bf16.msra.mxu0 %v188_v6  ;;  %207 = vmatpush.bf16.msra.mxu1 %v188_v6 }
  0x1b   :  { %208 = vmatpush.bf16.msra.mxu2 %v188_v6 }
  0x1e   :  { %113 = vmatpush.bf16.msra.mxu0 %v187_v7  ;;  %209 = vmatpush.bf16.msra.mxu1 %v187_v7 }
  0x1f   :  { %210 = vmatpush.bf16.msra.mxu2 %v187_v7 }
  0x21   :  { %114 = vmatmul.bf16.vlgmr.msra.gmra.mxu0 %v184_v8  ;;  %119 = vmatmul.bf16.vlgmr.msra.gmra.mxu1 %v185_v9 }
  0x22   :  { %124 = vmatmul.bf16.vlgmr.msra.gmra.mxu2 %v186_v10 }
  0x9e   :  { %v115_v12 = vpop.f32.mrf.mxu0  ;;  %v120_v13 = vpop.f32.mrf.mxu1 }
  0x9f   :  { %v116_v14 = vadd.f32 %v211_v11, %v115_v12  ;;  %v121_v15 = vadd.f32 %v211_v11, %v120_v13 }
  0xa1   :  { %130 = vst [vmem:[%s289_s3] sm:$0xff] %v116_v14 }
  0xa2   :  { %132 = vst [vmem:[%s289_s3 + $0x10] sm:$0xff] %v121_v15 }
  0xa5   :  { %v125_v16 = vpop.f32.mrf.mxu2 }
  0xa6   :  { %v126_v17 = vadd.f32 %v211_v11, %v125_v16  ;;  %v117_v18 = vpop.f32.mrf.mxu0  ;;  %v122_v19 = vpop.f32.mrf.mxu1 }
  0xa7   :  { %v118_v20 = vadd.f32 %v211_v11, %v117_v18  ;;  %v123_v21 = vadd.f32 %v211_v11, %v122_v19 }
  0xa8   :  { %134 = vst [vmem:[%s289_s3 + $0x20] sm:$0xff] %v126_v17 }
  0xa9   :  { %131 = vst [vmem:[%s289_s3 + $0x8] sm:$0xff] %v118_v20 }
  0xaa   :  { %133 = vst [vmem:[%s289_s3 + $0x18] sm:$0xff] %v123_v21 }
  0xad   :  { %v127_v22 = vpop.f32.mrf.mxu2 }
  0xae   :  { %v128_v23 = vadd.f32 %v211_v11, %v127_v22 }
  0xb0   :  { %135 = vst [vmem:[%s289_s3 + $0x28] sm:$0xff] %v128_v23 }

// kernel: vit_forward.12
= control target key start
LH: loop header
LB: loop body
LE: loop exit
PB: predicated region body
PF: predicated region fallthrough
CT: control target
= control target key end

     0   :  { %s324_s1 = inlined_call_operand.vmem [shape: bf16[128,128], index: 1, kind: input, shape index: {}]   ;;  %s325_s2 = inlined_call_operand.vmem [shape: f32[1,128], index: 2, kind: input, shape index: {}]   ;;  %s326_s0 = inlined_call_operand.vmem [shape: bf16[48,128], index: 0, kind: input, shape index: {}]   ;;  %s327_s3 = inlined_call_operand.vmem [shape: f32[48,128], index: 3, kind: input, shape index: {}]   ;;  %s328_s4 = inlined_call_operand.vmem [shape: f32[48,128], index: 4, kind: output, shape index: {}]  }
   0x1   :  { %v209_v0 = vld [vmem:[%s324_s1 + $0x38] sm:$0xff]  ;;  %v208_v1 = vld [vmem:[%s324_s1 + $0x30] sm:$0xff]  ;;  %v207_v2 = vld [vmem:[%s324_s1 + $0x28] sm:$0xff] }
   0x2   :  { %109 = vmatpush.bf16.msra.mxu0 %v209_v0  ;;  %210 = vmatpush.bf16.msra.mxu1 %v209_v0  ;;  %v206_v3 = vld [vmem:[%s324_s1 + $0x20] sm:$0xff]  ;;  %v205_v4 = vld [vmem:[%s324_s1 + $0x18] sm:$0xff]  ;;  %v204_v5 = vld [vmem:[%s324_s1 + $0x10] sm:$0xff] }
   0x3   :  { %211 = vmatpush.bf16.msra.mxu2 %v209_v0  ;;  %v203_v6 = vld [vmem:[%s324_s1 + $0x8] sm:$0xff]  ;;  %v202_v7 = vld [vmem:[%s324_s1] sm:$0xff]  ;;  %v201_v10 = vld [vmem:[%s326_s0 + $0x10] sm:$0xff] }
   0x4   :  { %v199_v8 = vld [vmem:[%s326_s0] sm:$0xff]  ;;  %v200_v9 = vld [vmem:[%s326_s0 + $0x8] sm:$0xff]  ;;  %v135_v15 = vld [vmem:[%s327_s3 + $0x10] sm:$0xff] }
   0x5   :  { %v226_v11 = vld [vmem:[%s325_s2] ss:$0 sm:$0xff]  ;;  %v134_v24 = vld [vmem:[%s327_s3 + $0x8] sm:$0xff]  ;;  %v136_v26 = vld [vmem:[%s327_s3 + $0x18] sm:$0xff] }
   0x6   :  { %110 = vmatpush.bf16.msra.mxu0 %v208_v1  ;;  %212 = vmatpush.bf16.msra.mxu1 %v208_v1  ;;  %v133_v13 = vld [vmem:[%s327_s3] sm:$0xff]  ;;  %v138_v33 = vld [vmem:[%s327_s3 + $0x28] sm:$0xff] }
   0x7   :  { %213 = vmatpush.bf16.msra.mxu2 %v208_v1  ;;  %v137_v21 = vld [vmem:[%s327_s3 + $0x20] sm:$0xff] }
   0xa   :  { %111 = vmatpush.bf16.msra.mxu0 %v207_v2  ;;  %214 = vmatpush.bf16.msra.mxu1 %v207_v2 }
   0xb   :  { %215 = vmatpush.bf16.msra.mxu2 %v207_v2 }
   0xe   :  { %112 = vmatpush.bf16.msra.mxu0 %v206_v3  ;;  %216 = vmatpush.bf16.msra.mxu1 %v206_v3 }
   0xf   :  { %217 = vmatpush.bf16.msra.mxu2 %v206_v3 }
  0x12   :  { %113 = vmatpush.bf16.msra.mxu0 %v205_v4  ;;  %218 = vmatpush.bf16.msra.mxu1 %v205_v4 }
  0x13   :  { %219 = vmatpush.bf16.msra.mxu2 %v205_v4 }
  0x16   :  { %114 = vmatpush.bf16.msra.mxu0 %v204_v5  ;;  %220 = vmatpush.bf16.msra.mxu1 %v204_v5 }
  0x17   :  { %221 = vmatpush.bf16.msra.mxu2 %v204_v5 }
  0x1a   :  { %115 = vmatpush.bf16.msra.mxu0 %v203_v6  ;;  %222 = vmatpush.bf16.msra.mxu1 %v203_v6 }
  0x1b   :  { %223 = vmatpush.bf16.msra.mxu2 %v203_v6 }
  0x1e   :  { %116 = vmatpush.bf16.msra.mxu0 %v202_v7  ;;  %224 = vmatpush.bf16.msra.mxu1 %v202_v7 }
  0x1f   :  { %225 = vmatpush.bf16.msra.mxu2 %v202_v7 }
  0x21   :  { %117 = vmatmul.bf16.vlgmr.msra.gmra.mxu0 %v199_v8  ;;  %122 = vmatmul.bf16.vlgmr.msra.gmra.mxu1 %v200_v9 }
  0x22   :  { %127 = vmatmul.bf16.vlgmr.msra.gmra.mxu2 %v201_v10 }
  0x9e   :  { %v118_v12 = vpop.f32.mrf.mxu0  ;;  %v123_v14 = vpop.f32.mrf.mxu1 }
  0x9f   :  { %v119_v16 = vadd.f32 %v226_v11, %v118_v12  ;;  %v124_v17 = vadd.f32 %v226_v11, %v123_v14 }
  0xa1   :  { %v139_v18 = vadd.f32 %v133_v13, %v119_v16  ;;  %v141_v19 = vadd.f32 %v135_v15, %v124_v17 }
  0xa3   :  { %145 = vst [vmem:[%s328_s4] sm:$0xff] %v139_v18 }
  0xa4   :  { %147 = vst [vmem:[%s328_s4 + $0x10] sm:$0xff] %v141_v19 }
  0xa5   :  { %v128_v20 = vpop.f32.mrf.mxu2 }
  0xa6   :  { %v129_v22 = vadd.f32 %v226_v11, %v128_v20  ;;  %v120_v23 = vpop.f32.mrf.mxu0  ;;  %v125_v25 = vpop.f32.mrf.mxu1 }
  0xa7   :  { %v121_v27 = vadd.f32 %v226_v11, %v120_v23  ;;  %v126_v28 = vadd.f32 %v226_v11, %v125_v25 }
  0xa8   :  { %v143_v29 = vadd.f32 %v137_v21, %v129_v22 }
  0xa9   :  { %v140_v30 = vadd.f32 %v134_v24, %v121_v27  ;;  %v142_v31 = vadd.f32 %v136_v26, %v126_v28 }
  0xaa   :  { %149 = vst [vmem:[%s328_s4 + $0x20] sm:$0xff] %v143_v29 }
  0xab   :  { %146 = vst [vmem:[%s328_s4 + $0x8] sm:$0xff] %v140_v30 }
  0xac   :  { %148 = vst [vmem:[%s328_s4 + $0x18] sm:$0xff] %v142_v31 }
  0xad   :  { %v130_v32 = vpop.f32.mrf.mxu2 }
  0xae   :  { %v131_v34 = vadd.f32 %v226_v11, %v130_v32 }
  0xb0   :  { %v144_v35 = vadd.f32 %v138_v33, %v131_v34 }
  0xb2   :  { %150 = vst [vmem:[%s328_s4 + $0x28] sm:$0xff] %v144_v35 }

// kernel: vit_forward.19
= control target key start
LH: loop header
LB: loop body
LE: loop exit
PB: predicated region body
PF: predicated region fallthrough
CT: control target
= control target key end

     0   :  { %s212_s1 = inlined_call_operand.vmem [shape: bf16[128,128], index: 1, kind: input, shape index: {}]   ;;  %s213_s2 = inlined_call_operand.vmem [shape: f32[1,128], index: 2, kind: input, shape index: {}]   ;;  %s214_s0 = inlined_call_operand.vmem [shape: bf16[16,128], index: 0, kind: input, shape index: {}]   ;;  %s215_s3 = inlined_call_operand.vmem [shape: f32[16,128], index: 3, kind: output, shape index: {}]  }
   0x1   :  { %v154_v0 = vld [vmem:[%s212_s1 + $0x38] sm:$0xff]  ;;  %v153_v1 = vld [vmem:[%s212_s1 + $0x30] sm:$0xff]  ;;  %v152_v2 = vld [vmem:[%s212_s1 + $0x28] sm:$0xff] }
   0x2   :  { %90 = vmatpush.bf16.msra.mxu0 %v154_v0  ;;  %v151_v3 = vld [vmem:[%s212_s1 + $0x20] sm:$0xff]  ;;  %v150_v4 = vld [vmem:[%s212_s1 + $0x18] sm:$0xff]  ;;  %v149_v5 = vld [vmem:[%s212_s1 + $0x10] sm:$0xff] }
   0x3   :  { %v148_v6 = vld [vmem:[%s212_s1 + $0x8] sm:$0xff]  ;;  %v147_v7 = vld [vmem:[%s212_s1] sm:$0xff] }
   0x4   :  { %v146_v8 = vld [vmem:[%s214_s0] sm:$0xff] }
   0x5   :  { %v155_v9 = vld [vmem:[%s213_s2] ss:$0 sm:$0xff] }
   0x6   :  { %91 = vmatpush.bf16.msra.mxu0 %v153_v1 }
   0xa   :  { %92 = vmatpush.bf16.msra.mxu0 %v152_v2 }
   0xe   :  { %93 = vmatpush.bf16.msra.mxu0 %v151_v3 }
  0x12   :  { %94 = vmatpush.bf16.msra.mxu0 %v150_v4 }
  0x16   :  { %95 = vmatpush.bf16.msra.mxu0 %v149_v5 }
  0x1a   :  { %96 = vmatpush.bf16.msra.mxu0 %v148_v6 }
  0x1e   :  { %97 = vmatpush.bf16.msra.mxu0 %v147_v7 }
  0x21   :  { %98 = vmatmul.bf16.vlgmr.msra.gmra.mxu0 %v146_v8 }
  0x9e   :  { %v99_v10 = vpop.f32.mrf.mxu0 }
  0x9f   :  { %v100_v11 = vadd.f32 %v155_v9, %v99_v10 }
  0xa1   :  { %104 = vst [vmem:[%s215_s3] sm:$0xff] %v100_v11 }
  0xa6   :  { %v101_v12 = vpop.f32.mrf.mxu0 }
  0xa7   :  { %v102_v13 = vadd.f32 %v155_v9, %v101_v12 }
  0xa9   :  { %105 = vst [vmem:[%s215_s3 + $0x8] sm:$0xff] %v102_v13 }

</bundles_post_ra>
